<compile_context>
chip_gen: v7x
topology: tpu7x:2x2x1
jax: 0.10.0
libtpu: 0.0.40
codegen_flags: <defaults>
</compile_context>

<pallas_src>
import functools

import jax
import jax.numpy as jnp
from jax.experimental import pallas as pl
from jax.experimental.pallas import tpu as pltpu


def _dual_focal_loss_kernel(x_ref, t_ref, o_ref, *, alpha, beta, gamma, rho,
                            eps, hw, needs_mask):
    # x_ref: (1, C, TR, 128)  logits block (any float dtype; cast to f32 here)
    # t_ref: (1, TR, 128)     integer labels block (int8/int16/int32)
    # o_ref: (1, 1, OR, 128)  f32 per-(batch, tile) partial-sum block
    j = pl.program_id(1)

    x = x_ref[0].astype(jnp.float32)              # (C, TR, 128)
    t = t_ref[0].astype(jnp.int32)                # (TR, 128)
    tr = x.shape[1]

    # --- softmax over the (leading) channel axis: VPU max/adds, one exp per
    #     element, one reciprocal per spatial column.  approx=True uses the
    #     EUP vrcp slot; one Newton-Raphson step restores ~f32 accuracy.
    m = jnp.max(x, axis=0, keepdims=True)         # (1, TR, 128)
    e = jnp.exp(x - m)                            # (C, TR, 128)
    denom = jnp.sum(e, axis=0, keepdims=True)     # (1, TR, 128)
    inv = pl.reciprocal(denom, approx=True)
    inv = inv * (2.0 - denom * inv)               # Newton refinement
    soft = e * inv

    # --- fused loss terms: exactly one log per element (first and second
    #     terms are mutually exclusive via the one-hot predicate).
    cls_idx = jax.lax.broadcasted_iota(jnp.int32, x.shape, 0)
    is_t = cls_idx == t[None, :, :]               # (C, TR, 128) bool

    log_arg = jnp.where(is_t, soft + eps, (rho + eps) - soft)
    term = jnp.log(log_arg)
    if beta != 1.0:
        term = jnp.where(is_t, term, beta * term)

    absdiff = jnp.where(is_t, 1.0 - soft, soft)   # == |one_hot - soft|
    if gamma == 1.0:                              # default: no pow (EUP) at all
        powd = absdiff
    elif gamma == 2.0:
        powd = absdiff * absdiff
    else:
        powd = absdiff ** gamma
    term = term + (powd if alpha == 1.0 else alpha * powd)

    # --- reduce over C first (leading-axis VPU adds) ...
    r = jnp.sum(term, axis=0)                     # (TR, 128)

    # ... then SELECT-mask the spatial padding / ragged tail.  A select (not a
    # multiply) so Inf/NaN from out-of-bounds garbage in a ragged last block
    # cannot leak into the sum.  Only traced when padding can exist.
    if needs_mask:
        row = jax.lax.broadcasted_iota(jnp.int32, (tr, 128), 0)
        lane = jax.lax.broadcasted_iota(jnp.int32, (tr, 128), 1)
        pos = (j * tr + row) * 128 + lane
        r = jnp.where(pos < hw, r, 0.0)

    # --- fold the tile to a single vreg-shaped (8, 128) slab (vreg-wise adds).
    #     For tiny spatial extents (TR not a multiple of 8) the rows are
    #     stored as-is and summed in the wrapper.
    if tr % 8 == 0:
        r = jnp.sum(r.reshape(tr // 8, 8, 128), axis=0)

    o_ref[...] = r[None, None, :, :]


def dual_focal_loss(inputs, targets, *, alpha=1.0, beta=1.0, gamma=1.0,
                    rho=1.0, eps=1e-6):
    """inputs: (B, C, H, W) float logits; targets: (B, H, W) integer labels."""
    B, C, H, W = inputs.shape
    HW = H * W
    R = pl.cdiv(HW, 128)

    x = inputs.reshape(B, C, HW)                  # no-copy collapse, keeps dtype
    t = targets.reshape(B, HW)
    if t.dtype not in (jnp.int8, jnp.int16, jnp.int32):
        t = t.astype(jnp.int32)                   # narrow labels pass through untouched

    # Only pad the sub-128 remainder (required to make the lane axis dense).
    # When HW % 128 == 0 (the common case) no HBM copy is made at all; the
    # raggedness of the last hw-tile is handled by the in-kernel mask.
    if R * 128 != HW:
        x = jnp.pad(x, ((0, 0), (0, 0), (0, R * 128 - HW)))
        t = jnp.pad(t, ((0, 0), (0, R * 128 - HW)))
    x = x.reshape(B, C, R, 128)
    t = t.reshape(B, R, 128)

    # --- tile sizing: ~2 MiB of logits per block (dtype-aware), rows a
    # multiple of 32, shrunk until double-buffered inputs + ~6 f32-sized
    # elementwise temporaries fit comfortably inside v7x's 32 MiB scoped VMEM.
    x_item = x.dtype.itemsize
    t_item = t.dtype.itemsize

    def vmem_est(tr):
        return 2 * (C * tr * 128 * x_item + tr * 128 * t_item) + 6 * C * tr * 128 * 4

    TR = max(32, ((2 << 20) // (C * 128 * x_item)) // 32 * 32)
    while TR > 32 and vmem_est(TR) > (24 << 20):
        TR -= 32
    if R <= TR:
        TR = R        # one block spans the whole spatial extent (full-dim block)
    num_tiles = pl.cdiv(R, TR)
    needs_mask = (num_tiles * TR * 128 != HW)
    out_rows = 8 if TR % 8 == 0 else TR          # tiny-R case stores raw rows

    # TODO(synk): for very large C even TR=32 exceeds the VMEM budget; a
    # C-tiled online-softmax variant would be needed there.  Bump the scoped
    # limit as a best-effort fallback.
    vmem_limit = int(max(32 << 20, min(vmem_est(TR) + (4 << 20), 100 << 20)))

    kernel = functools.partial(
        _dual_focal_loss_kernel,
        alpha=float(alpha), beta=float(beta), gamma=float(gamma),
        rho=float(rho), eps=float(eps), hw=HW, needs_mask=needs_mask,
    )

    partials = pl.pallas_call(
        kernel,
        out_shape=jax.ShapeDtypeStruct((B, num_tiles, out_rows, 128), jnp.float32),
        grid=(B, num_tiles),
        in_specs=[
            pl.BlockSpec((1, C, TR, 128), lambda b, j: (b, 0, j, 0)),
            pl.BlockSpec((1, TR, 128), lambda b, j: (b, j, 0)),
        ],
        out_specs=pl.BlockSpec((1, 1, out_rows, 128), lambda b, j: (b, j, 0, 0)),
        compiler_params=pltpu.CompilerParams(
            dimension_semantics=("parallel", "parallel"),
            vmem_limit_bytes=vmem_limit,
        ),
    )(x, t)

    # loss = -(sum of all per-element terms) / B
    return -jnp.sum(partials) / B


def _reference_loss(inputs, targets, alpha=1.0, beta=1.0, gamma=1.0, rho=1.0,
                    eps=1e-6):
    # Pure-JAX reference mirroring the PyTorch module (for correctness check).
    soft = jax.nn.softmax(inputs.astype(jnp.float32), axis=1)
    C = inputs.shape[1]
    one_hot = jax.nn.one_hot(targets, C, axis=1, dtype=jnp.float32)
    dims = (1, 2, 3)
    first = jnp.sum(jnp.log(soft + eps) * one_hot, dims)
    second = beta * jnp.sum((1.0 - one_hot) * jnp.log(rho - soft + eps), dims)
    third = alpha * jnp.sum(jnp.abs(one_hot - soft) ** gamma, dims)
    return -(first + second + third).mean()


if __name__ == "__main__":
    key = jax.random.PRNGKey(0)

    # Case 1: HW a multiple of 128 -> zero-copy path, no in-kernel masking.
    k_x, k_t = jax.random.split(key)
    B, C, H, W = 2, 4, 16, 16
    inputs = jax.random.normal(k_x, (B, C, H, W), dtype=jnp.float32)
    targets = jax.random.randint(k_t, (B, H, W), 0, C, dtype=jnp.int32)
    loss = dual_focal_loss(inputs, targets)
    jax.block_until_ready(loss)
    ref = _reference_loss(inputs, targets)
    assert jnp.allclose(loss, ref, rtol=1e-4, atol=1e-4), (loss, ref)

    # Case 2: HW not a multiple of 128 -> exercises the select-mask path and
    # the tiny-tile (TR < 8) output layout.
    k_x2, k_t2 = jax.random.split(k_x)
    B2, C2, H2, W2 = 2, 4, 10, 10
    inputs2 = jax.random.normal(k_x2, (B2, C2, H2, W2), dtype=jnp.float32)
    targets2 = jax.random.randint(k_t2, (B2, H2, W2), 0, C2, dtype=jnp.int32)
    loss2 = dual_focal_loss(inputs2, targets2)
    jax.block_until_ready(loss2)
    ref2 = _reference_loss(inputs2, targets2)
    assert jnp.allclose(loss2, ref2, rtol=1e-4, atol=1e-4), (loss2, ref2)

    print("KERNEL_OK")
</pallas_src>

<mosaic_0001>
module attributes {stable_mosaic.version = 11 : i64} {
  func.func @_dual_focal_loss_kernel(%arg0: i32, %arg1: i32, %arg2: memref<1x4x2x128xf32, #tpu.memory_space<vmem>>, %arg3: memref<1x2x128xi32, #tpu.memory_space<vmem>>, %arg4: memref<1x1x2x128xf32, #tpu.memory_space<vmem>>) attributes {dimension_semantics = [#tpu.dimension_semantics<parallel>, #tpu.dimension_semantics<parallel>], iteration_bounds = array<i64: 2, 1>, scalar_prefetch = 0 : i64, scratch_operands = 0 : i64, tpu.core_type = #tpu.core_type<tc>, window_params = [{transform_indices = @transform_0, window_bounds = array<i64: 1, 4, 2, 128>}, {transform_indices = @transform_1, window_bounds = array<i64: 1, 2, 128>}, {transform_indices = @transform_2, window_bounds = array<i64: 1, 1, 2, 128>}]} {
    %c0 = arith.constant 0 : index
    %c0_0 = arith.constant 0 : index
    %c0_1 = arith.constant 0 : index
    %c0_2 = arith.constant 0 : index
    %0 = vector.load %arg2[%c0, %c0_0, %c0_1, %c0_2] : memref<1x4x2x128xf32, #tpu.memory_space<vmem>>, vector<1x4x2x128xf32>
    %1 = vector.shape_cast %0 : vector<1x4x2x128xf32> to vector<4x2x128xf32>
    %c0_3 = arith.constant 0 : index
    %c0_4 = arith.constant 0 : index
    %c0_5 = arith.constant 0 : index
    %2 = vector.load %arg3[%c0_3, %c0_4, %c0_5] : memref<1x2x128xi32, #tpu.memory_space<vmem>>, vector<1x2x128xi32>
    %3 = vector.shape_cast %2 : vector<1x2x128xi32> to vector<2x128xi32>
    %cst = arith.constant dense<0xFF800000> : vector<2x128xf32>
    %4 = vector.multi_reduction <maximumf>, %1, %cst [0] : vector<4x2x128xf32> to vector<2x128xf32>
    %5 = vector.shape_cast %4 : vector<2x128xf32> to vector<1x2x128xf32>
    %6 = vector.broadcast %5 : vector<1x2x128xf32> to vector<4x2x128xf32>
    %7 = arith.subf %1, %6 : vector<4x2x128xf32>
    %8 = math.exp %7 : vector<4x2x128xf32>
    %cst_6 = arith.constant dense<0.000000e+00> : vector<2x128xf32>
    %9 = vector.multi_reduction <add>, %8, %cst_6 [0] : vector<4x2x128xf32> to vector<2x128xf32>
    %10 = vector.shape_cast %9 : vector<2x128xf32> to vector<1x2x128xf32>
    %11 = tpu.reciprocal %10 {approx = true} : vector<1x2x128xf32> -> vector<1x2x128xf32>
    %12 = arith.mulf %10, %11 : vector<1x2x128xf32>
    %cst_7 = arith.constant 2.000000e+00 : f32
    %13 = vector.broadcast %cst_7 : f32 to vector<1x2x128xf32>
    %14 = arith.subf %13, %12 : vector<1x2x128xf32>
    %15 = arith.mulf %11, %14 : vector<1x2x128xf32>
    %16 = vector.broadcast %15 : vector<1x2x128xf32> to vector<4x2x128xf32>
    %17 = arith.mulf %8, %16 : vector<4x2x128xf32>
    %18 = tpu.iota {dimensions = array<i32: 0>} : vector<4x2x128xi32>
    %19 = vector.shape_cast %3 : vector<2x128xi32> to vector<1x2x128xi32>
    %20 = vector.broadcast %19 : vector<1x2x128xi32> to vector<4x2x128xi32>
    %21 = arith.cmpi eq, %18, %20 : vector<4x2x128xi32>
    %cst_8 = arith.constant 9.99999997E-7 : f32
    %22 = vector.broadcast %cst_8 : f32 to vector<4x2x128xf32>
    %23 = arith.addf %17, %22 : vector<4x2x128xf32>
    %cst_9 = arith.constant 1.00000095 : f32
    %24 = vector.broadcast %cst_9 : f32 to vector<4x2x128xf32>
    %25 = arith.subf %24, %17 : vector<4x2x128xf32>
    %26 = arith.select %21, %23, %25 : vector<4x2x128xi1>, vector<4x2x128xf32>
    %27 = math.log %26 : vector<4x2x128xf32>
    %cst_10 = arith.constant 1.000000e+00 : f32
    %28 = vector.broadcast %cst_10 : f32 to vector<4x2x128xf32>
    %29 = arith.subf %28, %17 : vector<4x2x128xf32>
    %30 = arith.select %21, %29, %17 : vector<4x2x128xi1>, vector<4x2x128xf32>
    %31 = arith.addf %27, %30 : vector<4x2x128xf32>
    %cst_11 = arith.constant dense<0.000000e+00> : vector<2x128xf32>
    %32 = vector.multi_reduction <add>, %31, %cst_11 [0] : vector<4x2x128xf32> to vector<2x128xf32>
    %33 = vector.shape_cast %32 : vector<2x128xf32> to vector<1x1x2x128xf32>
    %c0_12 = arith.constant 0 : index
    %c0_13 = arith.constant 0 : index
    %c0_14 = arith.constant 0 : index
    %c0_15 = arith.constant 0 : index
    %34 = vector.load %arg4[%c0_12, %c0_13, %c0_14, %c0_15] : memref<1x1x2x128xf32, #tpu.memory_space<vmem>>, vector<1x1x2x128xf32>
    tpu.vector_store %arg4[%c0_12, %c0_13, %c0_14, %c0_15], %33 {strides = array<i32>} : memref<1x1x2x128xf32, #tpu.memory_space<vmem>>, vector<1x1x2x128xf32>,
    return
  }
  func.func @transform_0(%arg0: i32, %arg1: i32) -> (i32, i32, i32, i32) {
    %c0_i32 = arith.constant 0 : i32
    %c0_i32_0 = arith.constant 0 : i32
    %c0_i32_1 = arith.constant 0 : i32
    return %arg0, %c0_i32, %arg1, %c0_i32_0 : i32, i32, i32, i32
  }
  func.func @transform_1(%arg0: i32, %arg1: i32) -> (i32, i32, i32) {
    %c0_i32 = arith.constant 0 : i32
    %c0_i32_0 = arith.constant 0 : i32
    return %arg0, %arg1, %c0_i32 : i32, i32, i32
  }
  func.func @transform_2(%arg0: i32, %arg1: i32) -> (i32, i32, i32, i32) {
    %c0_i32 = arith.constant 0 : i32
    %c0_i32_0 = arith.constant 0 : i32
    %c0_i32_1 = arith.constant 0 : i32
    return %arg0, %arg1, %c0_i32, %c0_i32_0 : i32, i32, i32, i32
  }
}

</mosaic_0001>

<bundles_post_ra>
// kernel: tpu_custom_call.1
= control target key start
LH: loop header
LB: loop body
LE: loop exit
PB: predicated region body
PF: predicated region fallthrough
CT: control target
= control target key end

     0   :  { %7 = vsyncpa [#allocation3], 0  ;;  %s938_s0 = inlined_call_operand.hbm [shape: f32[2,4,2,128], index: 0, kind: input, shape index: {}]   ;;  %s939_s1 = inlined_call_operand.hbm [shape: s32[2,2,128], index: 1, kind: input, shape index: {}]   ;;  %s940_s2 = inlined_call_operand.hbm [shape: f32[2,1,2,128], index: 2, kind: output, shape index: {}]  }
   0x1   :  { %9 = vsyncpa [#allocation3 + $0x1], 0 }
   0x2   :  { %10 = vsyncpa [#allocation6], 0 }
   0x3   :  { %12 = vsyncpa [#allocation6 + $0x1], 0 }
   0x4   :  { %13 = vsyncpa [#allocation4], 0 }
   0x5   :  { %15 = vsyncpa [#allocation4 + $0x1], 0  ;;  %s696_s9 = smov 0   ;;  %s698_s10 = smov 0  }
   0x6   :  { %s700_s11 = smov 0   ;;  %s702_s12 = smov 0  }
   0x7   :  { %s704_s13 = smov 0   ;;  %s706_s14 = smov 0  }
   0x8 LB: > { %s423_s15 = sadd.s32 4294967295, %s674_s14   ;;  %s424_s16 = sadd.s32 4294967294, %s674_s14   ;;  %s674_s14 = sphi %s706_s14, %s21_s14   ;;  %s670_s13 = sphi %s704_s13, %s959_s13   ;;  %s666_s12 = sphi %s702_s12, %s958_s12   ;;  %s662_s11 = sphi %s700_s11, %s957_s11   ;;  %s658_s10 = sphi %s698_s10, %s956_s10   ;;  %s654_s9 = sphi %s696_s9, %s955_s9  }
   0x9   : > { %s33_s17 = sadd.s32 1, %s670_s13  ;;  %s42_s18 = sadd.s32 1, %s662_s11 }
   0xa   : > { %p35_p0 = scmp.ge.s32.totalorder %s33_s17, 2  ;;  %p49_p1 = scmp.ne.s32.totalorder %s662_s11, %s658_s10 }
   0xb   : > { %p50_p2 = scmp.eq.s32.totalorder %s674_s14, 0  ;;  %p55_p3 = scmp.ne.s32.totalorder %s658_s10, %s654_s9 }
   0xc   : > { %s961_s17 = smov (%p35_p0, %s33_s17), 0  ;;  %p56_p5 = scmp.eq.s32.totalorder %s423_s15, 0 }
   0xd   : > { %p737_p4 = por %p50_p2, %p49_p1  ;;  %s37_s20 = ssub.s32 %s670_s13, %s961_s17 }
   0xe   : > { %p109_p6 = scmp.eq.s32.totalorder %s423_s15, 1  ;;  %p40_p7 = scmp.eq.s32.totalorder %s37_s20, 0 }
   0xf   : > { %p743_p8 = por %p56_p5, %p55_p3  ;;  %p115_p10 = scmp.eq.s32.totalorder %s424_s16, 1 }
  0x10   : > { %p747_p9 = por %p109_p6, %p49_p1  ;;  %p458_p13 = scmp.lt.s32.totalorder %s674_s14, 2 }
  0x11   : > { %s944_s21 = scalar_select %p743_p8, 1, 0 }
  0x12   : > { %s945_s22 = scalar_select %p747_p9, 1, 0 }
  0x13   : > { %s752_s23 = scalar_select %p40_p7, %s662_s11, %s42_s18  }
  0x14   : > { %p754_p11 = por %p115_p10, %p55_p3  ;;  %s761_s25 = sand.u32 1, %s662_s11  }
  0x15   : > { %s427_s26 = sshll.u32 %s761_s25, 3  ;;  %s440_s27 = sshll.u32 %s670_s13, 7 }
  0x16   : > { %s946_s24 = scalar_select %p754_p11, 1, 0 }
  0x17   : > { %s768_s30 = scalar_lea.hbm %s938_s0, %s440_s27  ;;  %s139_s3 = scalar_lea.vmem [#allocation2], %s427_s26 }
  0x18   : > { %s147_s4 = sshll.u32 %s139_s3, 4  ;;  %p774_p0 = pnand %p458_p13, %p737_p4  ;;  %s770_s4 = int_to_ptr.vmem [resolvable:$true] %s147_s4 }
  0x19   : > { %s136_s6 = scalar_lea.sflag [#allocation3], %s761_s25  ;;  %s528_s7 = scalar_lea.hbm %s768_s30, 128 }
  0x1a   : > { %p529_p2 = scmp.ne.s32.totalorder %s768_s30, %s528_s7  ;;  %p530_p3 = pneg %p774_p0 }
  0x1b   : > { %s533_s16 = scalar_lea.hbm %s938_s0, 256  ;;  %p534_p4 = scmp.lt.u32.totalorder %s768_s30, %s938_s0 }
  0x1c   : > { %p531_p5 = pnand %p530_p3, %p529_p2  ;;  %p535_p7 = scmp.lt.u32.totalorder %s533_s16, %s528_s7 }
  0x1d   : > { %p537_p13 = scmp.lt.u32.totalorder %s528_s7, %s768_s30 }
  0x1e   : > { %p532_p6 = pneg %p531_p5  ;;  %p536_p10 = por %p535_p7, %p534_p4 }
  0x20   : > { %p538_p12 = por %p537_p13, %p536_p10 }
  0x22   : > { %p539_p1 = pnand %p538_p12, %p532_p6 }
  0x24   : > { %542 = shalt.err (!%p539_p1)
}
  0x25   : > { %s543_s20 = scalar_lea.vmem %s770_s4, 128  ;;  %s676_s26 = smov [#allocation2]  }
  0x26   : > { %p544_p2 = scmp.ne.s32.totalorder %s770_s4, %s543_s20  ;;  %s548_s27 = sshll.u32 %s676_s26, 4  ;;  %s549_s27 = int_to_ptr.vmem [resolvable:$false] %s548_s27 }
  0x27   : > { %s550_s28 = scalar_lea.vmem %s549_s27, 256  ;;  %p551_p9 = scmp.lt.s32.totalorder %s770_s4, %s549_s27 }
  0x28   : > { %p546_p5 = pnand %p544_p2, %p530_p3  ;;  %p552_p4 = scmp.lt.s32.totalorder %s550_s28, %s543_s20 }
  0x2a   : > { %p547_p11 = pneg %p546_p5  ;;  %p553_p7 = por %p552_p4, %p551_p9 }
  0x2c   : > { %p554_p10 = pnand %p553_p7, %p547_p11 }
  0x2e   : > { %557 = shalt.err (!%p554_p10)
}
  0x2f   : > { %s677_s29 = smov 32   ;;  %s678_s3 = smov 2  }
  0x30   : > { %450 = dma.hbm_to_vmem [thread:$0]  (!%p774_p0), %s768_s30, 128, %s770_s4, %s136_s6, %s677_s29, %s677_s29, %s678_s3  }
  0x31   : > { %p174_p12 = scmp.lt.s32.totalorder %s674_s14, 3  ;;  %s430_s7 = sshll.u32 %s761_s25, 1 }
  0x32   : > { %s431_s8 = sshll.u32 %s670_s13, 5  ;;  %p948_p9 = scmp.ge.s32.totalorder %s674_s14, 1 }
  0x33   : > { %s819_s19 = scalar_lea.hbm %s939_s1, %s431_s8  ;;  %s161_s20 = scalar_lea.vmem [#allocation5], %s430_s7 }
  0x34   : > { %p812_p11 = pnand %p948_p9, %p174_p12  ;;  %s169_s26 = sshll.u32 %s161_s20, 4  ;;  %s170_s26 = int_to_ptr.vmem [resolvable:$true] %s169_s26 }
  0x35   : > { %s158_s30 = scalar_lea.sflag [#allocation6], %s761_s25  ;;  %s558_s4 = scalar_lea.hbm %s819_s19, 32 }
  0x36   : > { %s949_s15 = scalar_select %p812_p11, 1, 0 }
  0x37   : > { %p559_p1 = scmp.ne.s32.totalorder %s819_s19, %s558_s4  ;;  %s563_s28 = scalar_lea.hbm %s939_s1, 64 }
  0x38   : > { %p564_p2 = scmp.lt.u32.totalorder %s819_s19, %s939_s1  ;;  %p565_p5 = scmp.lt.u32.totalorder %s563_s28, %s558_s4 }
  0x39   : > { %p561_p6 = pnand %p559_p1, %p530_p3  ;;  %p567_p7 = scmp.lt.u32.totalorder %s558_s4, %s819_s19 }
  0x3a   : > { %p566_p4 = por %p565_p5, %p564_p2 }
  0x3b   : > { %p562_p13 = pneg %p561_p6 }
  0x3c   : > { %p568_p10 = por %p567_p7, %p566_p4 }
  0x3e   : > { %p569_p12 = pnand %p568_p10, %p562_p13 }
  0x40   : > { %572 = shalt.err (!%p569_p12)
}
  0x41   : > { %s573_s25 = scalar_lea.vmem %s170_s26, 32  ;;  %s679_s7 = smov [#allocation5]  }
  0x42   : > { %p574_p9 = scmp.ne.s32.totalorder %s170_s26, %s573_s25  ;;  %s578_s8 = sshll.u32 %s679_s7, 4  ;;  %s579_s8 = int_to_ptr.vmem [resolvable:$false] %s578_s8 }
  0x43   : > { %s580_s16 = scalar_lea.vmem %s579_s8, 64  ;;  %p581_p8 = scmp.lt.s32.totalorder %s170_s26, %s579_s8 }
  0x44   : > { %p576_p1 = pnand %p574_p9, %p530_p3  ;;  %p582_p11 = scmp.lt.s32.totalorder %s580_s16, %s573_s25 }
  0x46   : > { %p577_p6 = pneg %p576_p1  ;;  %p583_p2 = por %p582_p11, %p581_p8 }
  0x48   : > { %p584_p5 = pnand %p583_p2, %p577_p6 }
  0x4a   : > { %587 = shalt.err (!%p584_p5)
}
  0x4b   : > { %453 = dma.hbm_to_vmem [thread:$0]  (!%p774_p0), %s819_s19, 32, %s170_s26, %s158_s30  }
  0x4c   : > { %p950_p13 = scmp.ne.s32.totalorder %s949_s15, 0 }
  0x4d   : > { %s844_s18 = sand.u32 (!%p950_p13), 1, %s658_s10   ;;  %p951_p3 = scmp.ne.s32.totalorder (!%p950_p13), %s944_s21, 0 }
  0x4e   : > { %178 = sbr.rel (%p950_p13) target bundleno = 179 (0xb3), region = 28  ;;  %s433_s20 = sshll.u32 (!%p950_p13), %s844_s18, 3 }
  0x4f   : > { %s181_s4 = scalar_lea.sflag (!%p950_p13), [#allocation3], %s844_s18  ;;  %s184_s6 = scalar_lea.vmem (!%p950_p13), [#allocation2], %s433_s20 }
  0x55   : > { %641 = dma.done.wait (%p951_p3), %s181_s4, 128  }
  0x56   : > { %643 = vsyncadd (%p951_p3), %s181_s4, 4294967168  ;;  %s434_s5 = sshll.u32 %s844_s18, 1  ;;  %s190_s15 = scalar_lea.sflag [#allocation6], %s844_s18 }
  0x57   : > { %s856_s19 = scalar_lea.vmem [#allocation5], %s434_s5 }
  0x58   : > { %645 = dma.done.wait (%p951_p3), %s190_s15, 32  }
  0x59   : > { %647 = vsyncadd (%p951_p3), %s190_s15, 4294967264  ;;  %vm224_vm0 = vcmask 1041408   ;;  %v219_v0 = vld [vmem:[%s184_s6] sm:$0x3]  ;;  %v220_v1 = vld [vmem:[%s184_s6 + $0x2] sm:$0x3] }
  0x5a   : > { %v221_v2 = vld [vmem:[%s184_s6 + $0x4] sm:$0x3]  ;;  %v222_v3 = vld [vmem:[%s184_s6 + $0x6] sm:$0x3]  ;;  %v225_v4 = vsel %vm224_vm0, %v219_v0, -inf  ;;  %v226_v5 = vsel %vm224_vm0, %v220_v1, -inf }
  0x5b   : > { %v227_v6 = vsel %vm224_vm0, %v221_v2, -inf  ;;  %v228_v7 = vsel %vm224_vm0, %v222_v3, -inf  ;;  %v229_v8 = vmax.f32 %v225_v4, %v226_v5  ;;  %v223_v33 = vld [vmem:[%s856_s19] sm:$0x3]  ;;  %s218_s21 = scalar_lea.vmem [#allocation7], %s434_s5  ;;  %s437_s30 = sshll.u32 %s666_s12, 5 }
  0x5c   : > { %v230_v9 = vmax.f32 %v227_v6, %v228_v7  ;;  %vm259_vm1 = vcmp.eq.s32.totalorder %v223_v33, 0  ;;  %vm260_vm2 = vcmp.eq.s32.totalorder %v223_v33, 1  ;;  %vm261_vm3 = vcmp.eq.s32.totalorder %v223_v33, 2  ;;  %s318_s26 = sshll.u32 %s218_s21, 4  ;;  %s891_s29 = scalar_lea.hbm %s940_s2, %s437_s30  ;;  %s886_s26 = int_to_ptr.vmem [resolvable:$true] %s318_s26 }
  0x5d   : > { %vm262_vm4 = vcmp.eq.s32.totalorder %v223_v33, 3  ;;  %s304_s3 = scalar_lea.sflag [#allocation4], %s844_s18  ;;  %s588_s25 = scalar_lea.vmem %s886_s26, 32 }
  0x5e   : > { %v231_v10 = vmax.f32 %v229_v8, %v230_v9  ;;  %p589_p8 = scmp.ne.s32.totalorder %s886_s26, %s588_s25  ;;  %p952_p0 = scmp.ne.s32.totalorder %s945_s22, 0 }
  0x5f   : > { %s680_s12 = smov [#allocation7]  }
  0x60   : > { %v232_v11 = vsub.f32 %v219_v0, %v231_v10  ;;  %v233_v12 = vsub.f32 %v220_v1, %v231_v10  ;;  %v234_v13 = vsub.f32 %v221_v2, %v231_v10  ;;  %v235_v14 = vsub.f32 %v222_v3, %v231_v10  ;;  %p590_p11 = pnand %p589_p8, %p952_p0  ;;  %s592_s7 = sshll.u32 %s680_s12, 4  ;;  %s593_s7 = int_to_ptr.vmem [resolvable:$false] %s592_s7 }
  0x61   : > { %s594_s8 = scalar_lea.vmem %s593_s7, 64  ;;  %p595_p7 = scmp.lt.s32.totalorder %s886_s26, %s593_s7 }
  0x62   : > { %v236_v15 = vmul.f32 1.442695, %v232_v11  ;;  %v238_v16 = vmul.f32 1.442695, %v233_v12  ;;  %v240_v17 = vmul.f32 1.442695, %v234_v13  ;;  %p591_p4 = pneg %p590_p11  ;;  %p596_p10 = scmp.lt.s32.totalorder %s594_s8, %s588_s25 }
  0x63   : > { %v242_v18 = vmul.f32 1.442695, %v235_v14 }
  0x64   : > { %510 = vpow2.f32 %v236_v15  ;;  %p597_p12 = por %p596_p10, %p595_p7 }
  0x65   : > { %512 = vpow2.f32 %v238_v16 }
  0x66   : > { %514 = vpow2.f32 %v240_v17  ;;  %p598_p9 = pnand %p597_p12, %p591_p4 }
  0x67   : > { %516 = vpow2.f32 %v242_v18 }
  0x6e   : > { %v511_v19 = vpop.eup %510 }
  0x6f   : > { %v513_v20 = vpop.eup %512  ;;  %v244_v21 = vsel %vm224_vm0, %v511_v19, 0.0 }
  0x70   : > { %v515_v22 = vpop.eup %514  ;;  %v245_v23 = vsel %vm224_vm0, %v513_v20, 0.0 }
  0x71   : > { %v517_v24 = vpop.eup %516  ;;  %v246_v25 = vadd.f32 %v245_v23, %v244_v21  ;;  %v247_v26 = vsel %vm224_vm0, %v515_v22, 0.0 }
  0x72   : > { %v249_v27 = vsel %vm224_vm0, %v517_v24, 0.0 }
  0x73   : > { %v248_v28 = vadd.f32 %v247_v26, %v246_v25 }
  0x75   : > { %v250_v29 = vadd.f32 %v249_v27, %v248_v28 }
  0x77   : > { %518 = vrcp.f32 %v250_v29 }
  0x81   : > { %v519_v30 = vpop.eup %518 }
  0x82   : > { %v252_v31 = vmul.f32 %v519_v30, %v250_v29 }
  0x84   : > { %v253_v32 = vsub.f32 2.0, %v252_v31 }
  0x86   : > { %v254_v34 = vmul.f32 %v519_v30, %v253_v32 }
  0x88   : > { %v255_v35 = vmul.f32 %v511_v19, %v254_v34  ;;  %v256_v36 = vmul.f32 %v513_v20, %v254_v34  ;;  %v257_v37 = vmul.f32 %v515_v22, %v254_v34  ;;  %v258_v38 = vmul.f32 %v517_v24, %v254_v34 }
  0x8a   : > { %v263_v39 = vadd.f32 1e-06, %v255_v35  ;;  %v264_v40 = vadd.f32 1e-06, %v256_v36  ;;  %v265_v41 = vadd.f32 1e-06, %v257_v37 }
  0x8b   : > { %v266_v42 = vadd.f32 1e-06, %v258_v38  ;;  %v267_v43 = vsub.f32 1.000001, %v255_v35  ;;  %v268_v44 = vsub.f32 1.000001, %v256_v36 }
  0x8c   : > { %v269_v45 = vsub.f32 1.000001, %v257_v37  ;;  %v270_v46 = vsub.f32 1.000001, %v258_v38  ;;  %v283_v51 = vsub.f32 1.0, %v255_v35  ;;  %v284_v52 = vsub.f32 1.0, %v256_v36 }
  0x8d   : > { %v271_v47 = vsel %vm259_vm1, %v263_v39, %v267_v43  ;;  %v272_v48 = vsel %vm260_vm2, %v264_v40, %v268_v44  ;;  %v285_v53 = vsub.f32 1.0, %v257_v37  ;;  %v286_v54 = vsub.f32 1.0, %v258_v38 }
  0x8e   : > { %v273_v49 = vsel %vm261_vm3, %v265_v41, %v269_v45  ;;  %v274_v50 = vsel %vm262_vm4, %v266_v42, %v270_v46  ;;  %520 = vlog2.f32 %v271_v47  ;;  %v287_v56 = vsel %vm259_vm1, %v283_v51, %v255_v35 }
  0x8f   : > { %522 = vlog2.f32 %v272_v48  ;;  %v288_v59 = vsel %vm260_vm2, %v284_v52, %v256_v36  ;;  %v289_v62 = vsel %vm261_vm3, %v285_v53, %v257_v37  ;;  %v290_v1 = vsel %vm262_vm4, %v286_v54, %v258_v38 }
  0x90   : > { %524 = vlog2.f32 %v273_v49 }
  0x91   : > { %526 = vlog2.f32 %v274_v50 }
  0x98   : > { %v521_v55 = vpop.eup %520 }
  0x99   : > { %v523_v57 = vpop.eup %522  ;;  %v276_v58 = vmul.f32 0.6931472, %v521_v55 }
  0x9a   : > { %v525_v60 = vpop.eup %524  ;;  %v278_v61 = vmul.f32 0.6931472, %v523_v57 }
  0x9b   : > { %v527_v63 = vpop.eup %526  ;;  %v280_v0 = vmul.f32 0.6931472, %v525_v60  ;;  %v291_v2 = vadd.f32 %v287_v56, %v276_v58 }
  0x9c   : > { %v282_v3 = vmul.f32 0.6931472, %v527_v63  ;;  %v292_v4 = vadd.f32 %v288_v59, %v278_v61 }
  0x9d   : > { %v293_v5 = vadd.f32 %v289_v62, %v280_v0  ;;  %v295_v6 = vsel %vm224_vm0, %v291_v2, 0.0 }
  0x9e   : > { %v294_v7 = vadd.f32 %v290_v1, %v282_v3  ;;  %v296_v8 = vsel %vm224_vm0, %v292_v4, 0.0 }
  0x9f   : > { %v297_v9 = vadd.f32 %v296_v8, %v295_v6  ;;  %v298_v10 = vsel %vm224_vm0, %v293_v5, 0.0 }
  0xa0   : > { %v300_v11 = vsel %vm224_vm0, %v294_v7, 0.0 }
  0xa1   : > { %v299_v12 = vadd.f32 %v298_v10, %v297_v9 }
  0xa3   : > { %v301_v13 = vadd.f32 %v300_v11, %v299_v12 }
  0xa5   : > { %302 = vst [vmem:[%s218_s21] sm:$0x3] %v301_v13 }
  0xa6   : > { %601 = shalt.err (!%p598_p9)
}
  0xa7   : > { %s602_s16 = scalar_lea.hbm %s891_s29, 32  ;;  %s606_s4 = scalar_lea.hbm %s940_s2, 64 }
  0xa8   : > { %p603_p1 = scmp.ne.s32.totalorder %s891_s29, %s602_s16  ;;  %p607_p5 = scmp.lt.u32.totalorder %s891_s29, %s940_s2 }
  0xa9   : > { %p608_p13 = scmp.lt.u32.totalorder %s606_s4, %s602_s16  ;;  %p610_p8 = scmp.lt.u32.totalorder %s602_s16, %s891_s29 }
  0xaa   : > { %p604_p6 = pnand %p603_p1, %p952_p0 }
  0xab   : > { %p609_p3 = por %p608_p13, %p607_p5 }
  0xac   : > { %p605_p2 = pneg %p604_p6 }
  0xad   : > { %p611_p11 = por %p610_p8, %p609_p3 }
  0xaf   : > { %p612_p4 = pnand %p611_p11, %p605_p2 }
  0xb1   : > { %615 = shalt.err (!%p612_p4)
}
  0xb2   : > { %445 = dma.vmem_to_hbm [thread:$0]  (%p952_p0), %s886_s26, 32, %s891_s29, %s304_s3  }
  0xb3 PF: > { %s330_s15 = sand.u32 1, %s654_s9   ;;  %p953_p7 = scmp.ne.s32.totalorder %s946_s24, 0 }
  0xb4   : > { %p954_p10 = scmp.ge.s32.totalorder %s674_s14, 2  ;;  %s331_s19 = scalar_lea.sflag [#allocation4], %s330_s15 }
  0xb6   : > { %p455_p12 = pnand %p954_p10, %p953_p7 }
  0xb8   : > { %649 = dma.done.wait (!%p455_p12), %s331_s19, 32  }
  0xb9   : > { %651 = vsyncadd (!%p455_p12), %s331_s19, 4294967264  ;;  %s21_s14 = sadd.s32 1, %s674_s14   ;;  %s955_s9 = smov %s658_s10 }
  0xba   : > { %p18_p9 = scmp.ge.s32.totalorder %s21_s14, 4   ;;  %s956_s10 = smov %s662_s11 }
  0xbb   : > { %s957_s11 = smov %s752_s23  ;;  %s958_s12 = smov %s670_s13 }
  0xbc   : > { %s959_s13 = smov %s961_s17  ;;  %20 = sbr.rel (!%p18_p9) target bundleno = 8 (0x8), region = 86 }
  0xc3   :  { %336 = vsyncpa [#allocation3], 1 }
  0xc4   :  { %338 = vsyncpa [#allocation3 + $0x1], 1 }
  0xc5   :  { %339 = vsyncpa [#allocation6], 1 }
  0xc6   :  { %341 = vsyncpa [#allocation6 + $0x1], 1 }
  0xc7   :  { %342 = vsyncpa [#allocation4], 1 }
  0xc8   :  { %344 = vsyncpa [#allocation4 + $0x1], 1 }

</bundles_post_ra>
